<compile_context>
chip_gen: v7x
topology: tpu7x:2x2x1
jax: 0.10.0
libtpu: 0.0.40
codegen_flags: <defaults>
</compile_context>

<pallas_src>
import numpy as np
import jax
import jax.numpy as jnp
from jax.experimental import pallas as pl
from jax.experimental.pallas import tpu as pltpu


_LANE_CANDIDATES = (4096, 2048, 1024, 512, 256, 128)   # lane-dense last-dim choices
_TARGET_BLOCK_BYTES = 2 << 20              # ~2 MiB per stream per grid step
_VMEM_BUDGET_BYTES = 24 << 20              # keep 2*(N+1)*block under this
_VMEM_LIMIT_BYTES = 32 << 20               # scoped-VMEM request (safe on all chips)


def _make_combination_kernel(num_inputs):
    """Kernel body for a fixed number of inputs.

    Signature: (w_ref, x0_ref, ..., x{N-1}_ref, o_ref)
      w_ref : SMEM f32[N]
      x_i   : VMEM (TR, L) tile of input i
      o_ref : VMEM (TR, L) output tile
    """

    def kernel(w_ref, *refs):
        x_refs = refs[:num_inputs]
        o_ref = refs[num_inputs]

        # Hoist the scalar weight reads once per grid step (SMEM -> sreg).
        w = [w_ref[i] for i in range(num_inputs)]

        acc = w[0] * x_refs[0][...].astype(jnp.float32)
        for i in range(1, num_inputs):            # small static unrolled loop
            acc = acc + w[i] * x_refs[i][...].astype(jnp.float32)

        o_ref[...] = acc.astype(o_ref.dtype)

    return kernel


def combination_layer(weights, *inputs):
    """Pallas implementation of CombinationLayer.forward(*inputs)."""
    num_inputs = len(inputs)
    assert num_inputs >= 1
    assert weights.shape == (num_inputs,)
    orig_shape = inputs[0].shape
    dtype = inputs[0].dtype
    itemsize = int(np.dtype(dtype).itemsize)
    total = int(np.prod(orig_shape))

    # ---- choose a lane-dense layout -------------------------------------
    lanes = None
    for cand in _LANE_CANDIDATES:
        if total % cand == 0:
            lanes = cand
            break
    if lanes is None:
        lanes = 128                      # pad (one extra copy) only in this rare case
    padded_total = ((total + lanes - 1) // lanes) * lanes
    pad = padded_total - total
    rows = padded_total // lanes

    # ---- row tile: ~2 MiB/stream, double-buffered (N+1) streams in VMEM --
    per_stream = min(_TARGET_BLOCK_BYTES,
                     _VMEM_BUDGET_BYTES // (2 * (num_inputs + 1)))
    tile_rows = per_stream // (lanes * itemsize)
    tile_rows = max(8, (int(tile_rows) // 8) * 8)
    if tile_rows >= rows:
        tile_rows = rows                 # single block == full row extent
        grid = (1,)
    else:
        grid = (pl.cdiv(rows, tile_rows),)   # ragged last block is masked by Pallas

    # ---- flatten each input (metadata-only reshape unless padding) -------
    def to_slab(x):
        flat = x.reshape(-1)
        if pad:
            flat = jnp.pad(flat, (0, pad))
        return flat.reshape(rows, lanes)

    slabs = [to_slab(x) for x in inputs]
    weights_f32 = weights.astype(jnp.float32)

    data_spec = pl.BlockSpec((tile_rows, lanes), lambda i: (i, 0))
    kernel = _make_combination_kernel(num_inputs)

    cost = pl.CostEstimate(
        flops=2 * num_inputs * padded_total,
        transcendentals=0,
        bytes_accessed=(num_inputs + 1) * padded_total * itemsize,
    )

    out = pl.pallas_call(
        kernel,
        out_shape=jax.ShapeDtypeStruct((rows, lanes), dtype),
        grid=grid,
        in_specs=[pl.BlockSpec(memory_space=pltpu.SMEM)]       # weights (scalars)
                 + [data_spec] * num_inputs,                   # N input streams
        out_specs=data_spec,
        compiler_params=pltpu.CompilerParams(
            dimension_semantics=("parallel",),
            vmem_limit_bytes=_VMEM_LIMIT_BYTES),
        cost_estimate=cost,
    )(weights_f32, *slabs)

    out_flat = out.reshape(-1)
    if pad:
        out_flat = out_flat[:total]      # drop lane-padding before reshaping back
    return out_flat.reshape(orig_shape)


if __name__ == "__main__":
    num_inputs = 3
    B, C, H, W = 2, 4, 16, 16

    # Deterministic parameter init, matching nn.Parameter(1/N * ones(N)).
    weights = jnp.full((num_inputs,), 1.0 / num_inputs, dtype=jnp.float32)

    # Deterministic example inputs.
    key = jax.random.PRNGKey(0)
    keys = jax.random.split(key, num_inputs)
    inputs = [jax.random.normal(k, (B, C, H, W), dtype=jnp.float32) for k in keys]

    out = combination_layer(weights, *inputs)
    out = jax.block_until_ready(out)

    # Reference check (plain JAX, mirrors the PyTorch forward exactly).
    ref = sum(weights[i] * x for i, x in enumerate(inputs))
    np.testing.assert_allclose(np.asarray(out), np.asarray(ref), rtol=1e-6, atol=1e-6)

    print("KERNEL_OK")
</pallas_src>

<mosaic_0001>
module attributes {stable_mosaic.version = 11 : i64} {
  func.func @kernel(%arg0: i32, %arg1: memref<3xf32, #tpu.memory_space<smem>>, %arg2: memref<1x2048xf32, #tpu.memory_space<vmem>>, %arg3: memref<1x2048xf32, #tpu.memory_space<vmem>>, %arg4: memref<1x2048xf32, #tpu.memory_space<vmem>>, %arg5: memref<1x2048xf32, #tpu.memory_space<vmem>>) attributes {dimension_semantics = [#tpu.dimension_semantics<parallel>], iteration_bounds = array<i64: 1>, scalar_prefetch = 0 : i64, scratch_operands = 0 : i64, tpu.core_type = #tpu.core_type<tc>, window_params = [{transform_indices = @transform_0, window_bounds = array<i64: 3>}, {transform_indices = @transform_1, window_bounds = array<i64: 1, 2048>}, {transform_indices = @transform_2, window_bounds = array<i64: 1, 2048>}, {transform_indices = @transform_3, window_bounds = array<i64: 1, 2048>}, {transform_indices = @transform_4, window_bounds = array<i64: 1, 2048>}]} {
    %c0 = arith.constant 0 : index
    %0 = memref.load %arg1[%c0] : memref<3xf32, #tpu.memory_space<smem>>
    %c1 = arith.constant 1 : index
    %1 = memref.load %arg1[%c1] : memref<3xf32, #tpu.memory_space<smem>>
    %c2 = arith.constant 2 : index
    %2 = memref.load %arg1[%c2] : memref<3xf32, #tpu.memory_space<smem>>
    %c0_0 = arith.constant 0 : index
    %c0_1 = arith.constant 0 : index
    %3 = vector.load %arg2[%c0_0, %c0_1] : memref<1x2048xf32, #tpu.memory_space<vmem>>, vector<1x2048xf32>
    %4 = vector.broadcast %0 : f32 to vector<1x2048xf32>
    %5 = arith.mulf %4, %3 : vector<1x2048xf32>
    %c0_2 = arith.constant 0 : index
    %c0_3 = arith.constant 0 : index
    %6 = vector.load %arg3[%c0_2, %c0_3] : memref<1x2048xf32, #tpu.memory_space<vmem>>, vector<1x2048xf32>
    %7 = vector.broadcast %1 : f32 to vector<1x2048xf32>
    %8 = arith.mulf %7, %6 : vector<1x2048xf32>
    %9 = arith.addf %5, %8 : vector<1x2048xf32>
    %c0_4 = arith.constant 0 : index
    %c0_5 = arith.constant 0 : index
    %10 = vector.load %arg4[%c0_4, %c0_5] : memref<1x2048xf32, #tpu.memory_space<vmem>>, vector<1x2048xf32>
    %11 = vector.broadcast %2 : f32 to vector<1x2048xf32>
    %12 = arith.mulf %11, %10 : vector<1x2048xf32>
    %13 = arith.addf %9, %12 : vector<1x2048xf32>
    %c0_6 = arith.constant 0 : index
    %c0_7 = arith.constant 0 : index
    %14 = vector.load %arg5[%c0_6, %c0_7] : memref<1x2048xf32, #tpu.memory_space<vmem>>, vector<1x2048xf32>
    tpu.vector_store %arg5[%c0_6, %c0_7], %13 {strides = array<i32>} : memref<1x2048xf32, #tpu.memory_space<vmem>>, vector<1x2048xf32>,
    return
  }
  func.func @transform_0(%arg0: i32) -> i32 {
    %c0_i32 = arith.constant 0 : i32
    %c0_i32_0 = arith.constant 0 : i32
    return %c0_i32 : i32
  }
  func.func @transform_1(%arg0: i32) -> (i32, i32) {
    %c0_i32 = arith.constant 0 : i32
    %c0_i32_0 = arith.constant 0 : i32
    return %arg0, %c0_i32 : i32, i32
  }
  func.func @transform_2(%arg0: i32) -> (i32, i32) {
    %c0_i32 = arith.constant 0 : i32
    %c0_i32_0 = arith.constant 0 : i32
    return %arg0, %c0_i32 : i32, i32
  }
  func.func @transform_3(%arg0: i32) -> (i32, i32) {
    %c0_i32 = arith.constant 0 : i32
    %c0_i32_0 = arith.constant 0 : i32
    return %arg0, %c0_i32 : i32, i32
  }
  func.func @transform_4(%arg0: i32) -> (i32, i32) {
    %c0_i32 = arith.constant 0 : i32
    %c0_i32_0 = arith.constant 0 : i32
    return %arg0, %c0_i32 : i32, i32
  }
}

</mosaic_0001>

<bundles_post_ra>
// kernel: tpu_custom_call.1
= control target key start
LH: loop header
LB: loop body
LE: loop exit
PB: predicated region body
PF: predicated region fallthrough
CT: control target
= control target key end

     0   :  { %9 = vsyncpa [#allocation5], 0  ;;  %s308_s0 = inlined_call_operand.hbm [shape: f32[3], index: 0, kind: input, shape index: {}]   ;;  %s309_s1 = inlined_call_operand.hbm [shape: f32[1,2048], index: 1, kind: input, shape index: {}]   ;;  %s310_s2 = inlined_call_operand.hbm [shape: f32[1,2048], index: 2, kind: input, shape index: {}]   ;;  %s311_s3 = inlined_call_operand.hbm [shape: f32[1,2048], index: 3, kind: input, shape index: {}]   ;;  %s312_s4 = inlined_call_operand.hbm [shape: f32[1,2048], index: 4, kind: output, shape index: {}]  }
   0x1   :  { %10 = vsyncpa [#allocation3], 0 }
   0x2   :  { %11 = vsyncpa [#allocation8], 0 }
   0x3   :  { %12 = vsyncpa [#allocation4], 0  ;;  %s218_s15 = smov [#allocation7]   ;;  %s219_s17 = smov [#allocation6]  }
   0x4   :  { %s37_s16 = sshll.u32 %s218_s15, 4  ;;  %s27_s18 = sshll.u32 %s219_s17, 4  ;;  %s38_s16 = int_to_ptr.vmem [resolvable:$true] %s37_s16  ;;  %s28_s18 = int_to_ptr.vmem [resolvable:$true] %s27_s18 }
   0x5   :  { %s112_s21 = scalar_lea.hbm %s310_s2, 256 }
   0x6   :  { %p113_p0 = scmp.ne.s32.totalorder %s310_s2, %s112_s21  ;;  %p116_p1 = scmp.lt.u32.totalorder %s112_s21, %s310_s2 }
   0x8   :  { %p118_p2 = pnand %p116_p1, %p113_p0 }
   0xa   :  { %121 = shalt.err (!%p118_p2)
}
   0xb   :  { %s122_s26 = scalar_lea.vmem %s38_s16, 256  ;;  %p127_p4 = scmp.lt.s32.totalorder %s38_s16, %s38_s16 }
   0xc   :  { %p123_p3 = scmp.ne.s32.totalorder %s38_s16, %s122_s26  ;;  %p128_p5 = scmp.lt.s32.totalorder %s122_s26, %s122_s26 }
   0xe   :  { %p129_p6 = por %p128_p5, %p127_p4 }
  0x10   :  { %p130_p7 = pnand %p129_p6, %p123_p3 }
  0x12   :  { %133 = shalt.err (!%p130_p7)
}
  0x13   :  { %40 = dma.hbm_to_vmem [thread:$0]  %s310_s2, 256, %s38_s16, [#allocation8]  }
  0x14   :  { %s134_s5 = scalar_lea.hbm %s308_s0, 16 }
  0x15   :  { %p135_p8 = scmp.ne.s32.totalorder %s308_s0, %s134_s5  ;;  %p138_p9 = scmp.lt.u32.totalorder %s134_s5, %s308_s0 }
  0x17   :  { %p140_p10 = pnand %p138_p9, %p135_p8 }
  0x19   :  { %143 = shalt.err (!%p140_p10)
}
  0x1a   :  { %s220_s10 = smov [#allocation2]   ;;  %s144_s14 = scalar_lea.hbm %s309_s1, 256 }
  0x1b   :  { %20 = dma.hbm_to_smem %s308_s0, 16, %s220_s10, [#allocation5]  }
  0x1c   :  { %p145_p11 = scmp.ne.s32.totalorder %s309_s1, %s144_s14  ;;  %p148_p12 = scmp.lt.u32.totalorder %s144_s14, %s309_s1 }
  0x1e   :  { %p150_p13 = pnand %p148_p12, %p145_p11 }
  0x20   :  { %153 = shalt.err (!%p150_p13)
}
  0x21   :  { %s154_s20 = scalar_lea.vmem %s28_s18, 256  ;;  %p159_p1 = scmp.lt.s32.totalorder %s28_s18, %s28_s18 }
  0x22   :  { %p155_p0 = scmp.ne.s32.totalorder %s28_s18, %s154_s20  ;;  %p160_p2 = scmp.lt.s32.totalorder %s154_s20, %s154_s20 }
  0x24   :  { %p161_p3 = por %p160_p2, %p159_p1 }
  0x26   :  { %p162_p4 = pnand %p161_p3, %p155_p0 }
  0x28   :  { %165 = shalt.err (!%p162_p4)
}
  0x29   :  { %30 = dma.hbm_to_vmem [thread:$0]  %s309_s1, 256, %s28_s18, [#allocation3]  }
  0x2a   :  { %s221_s22 = smov [#allocation9]   ;;  %s166_s26 = scalar_lea.hbm %s311_s3, 256 }
  0x2b   :  { %s47_s23 = sshll.u32 %s221_s22, 4  ;;  %p167_p5 = scmp.ne.s32.totalorder %s311_s3, %s166_s26  ;;  %s48_s23 = int_to_ptr.vmem [resolvable:$true] %s47_s23 }
  0x2c   :  { %p170_p6 = scmp.lt.u32.totalorder %s166_s26, %s311_s3 }
  0x2e   :  { %p172_p7 = pnand %p170_p6, %p167_p5 }
  0x30   :  { %175 = shalt.err (!%p172_p7)
}
  0x31   :  { %s176_s5 = scalar_lea.vmem %s48_s23, 256  ;;  %p181_p9 = scmp.lt.s32.totalorder %s48_s23, %s48_s23 }
  0x32   :  { %p177_p8 = scmp.ne.s32.totalorder %s48_s23, %s176_s5  ;;  %p182_p10 = scmp.lt.s32.totalorder %s176_s5, %s176_s5 }
  0x34   :  { %p183_p11 = por %p182_p10, %p181_p9 }
  0x36   :  { %p184_p12 = pnand %p183_p11, %p177_p8 }
  0x38   :  { %187 = shalt.err (!%p184_p12)
}
  0x39   :  { %50 = dma.hbm_to_vmem [thread:$0]  %s311_s3, 256, %s48_s23, [#allocation8]  }
  0x3a   :  { %210 = dma.done.wait [#allocation5], 16  }
  0x3b   :  { %211 = vsyncadd [#allocation5], 4294967280 }
  0x3c   :  { %212 = dma.done.wait [#allocation3], 256  }
  0x3d   :  { %213 = vsyncadd [#allocation3], 4294967040 }
  0x3e   :  { %214 = dma.done.wait [#allocation8], 512  }
  0x3f   :  { %215 = vsyncadd [#allocation8], 4294966784 }
  0x40   :  { %63 = sfence }
  0x41   :  { %s64_s6 = sld [smem:[#allocation2]]  ;;  %s105_s7 = sld [smem:[#allocation2 + $0x1]]  ;;  %v67_v0 = vld [vmem:[#allocation6] sm:$0xff]  ;;  %v72_v1 = vld [vmem:[#allocation7] sm:$0xff]  ;;  %v68_v2 = vld [vmem:[#allocation6 + $0x8] sm:$0xff] }
  0x42   :  { %s106_s8 = sld [smem:[#allocation2 + $0x2]]  ;;  %v79_v3 = vld [vmem:[#allocation9] sm:$0xff]  ;;  %v73_v4 = vld [vmem:[#allocation7 + $0x8] sm:$0xff]  ;;  %v80_v5 = vld [vmem:[#allocation9 + $0x8] sm:$0xff]  ;;  %s222_s3 = smov [#allocation10]  }
  0x43   :  { %s94_s9 = sshll.u32 %s222_s3, 4  ;;  %s95_s9 = int_to_ptr.vmem [resolvable:$true] %s94_s9 }
  0x44   :  { %s188_s10 = scalar_lea.vmem %s95_s9, 256  ;;  %p193_p0 = scmp.lt.s32.totalorder %s95_s9, %s95_s9 }
  0x45   :  { %p189_p13 = scmp.ne.s32.totalorder %s95_s9, %s188_s10  ;;  %p194_p1 = scmp.lt.s32.totalorder %s188_s10, %s188_s10 }
  0x47   :  { %v69_v6 = vstv %s64_s6  ;;  %v74_v7 = vstv %s105_s7  ;;  %p195_p2 = por %p194_p1, %p193_p0 }
  0x48   :  { %v70_v8 = vmul.f32 %v69_v6, %v67_v0  ;;  %v75_v9 = vmul.f32 %v74_v7, %v72_v1  ;;  %v81_v10 = vstv %s106_s8  ;;  %v71_v11 = vmul.f32 %v69_v6, %v68_v2 }
  0x49   :  { %v82_v12 = vmul.f32 %v81_v10, %v79_v3  ;;  %v76_v13 = vmul.f32 %v74_v7, %v73_v4  ;;  %v83_v14 = vmul.f32 %v81_v10, %v80_v5  ;;  %p196_p3 = pnand %p195_p2, %p189_p13 }
  0x4a   :  { %v77_v15 = vadd.f32 %v75_v9, %v70_v8 }
  0x4b   :  { %v78_v16 = vadd.f32 %v76_v13, %v71_v11 }
  0x4c   :  { %v84_v17 = vadd.f32 %v82_v12, %v77_v15 }
  0x4d   :  { %v85_v18 = vadd.f32 %v83_v14, %v78_v16 }
  0x4e   :  { %86 = vst [vmem:[#allocation10] sm:$0xff] %v84_v17 }
  0x4f   :  { %87 = vst [vmem:[#allocation10 + $0x8] sm:$0xff] %v85_v18 }
  0x50   :  { %199 = shalt.err (!%p196_p3)
}
  0x51   :  { %s200_s2 = scalar_lea.hbm %s312_s4, 256 }
  0x52   :  { %p201_p4 = scmp.ne.s32.totalorder %s312_s4, %s200_s2  ;;  %p204_p5 = scmp.lt.u32.totalorder %s200_s2, %s312_s4 }
  0x54   :  { %p206_p6 = pnand %p204_p5, %p201_p4 }
  0x56   :  { %209 = shalt.err (!%p206_p6)
}
  0x57   :  { %97 = dma.vmem_to_hbm [thread:$0]  %s95_s9, 256, %s312_s4, [#allocation4]  }
  0x58   :  { %216 = dma.done.wait [#allocation4], 256  }
  0x59   :  { %217 = vsyncadd [#allocation4], 4294967040 }
  0x5a   :  { %101 = vsyncpa [#allocation3], 1 }
  0x5b   :  { %102 = vsyncpa [#allocation8], 1 }
  0x5c   :  { %103 = vsyncpa [#allocation4], 1 }
  0x5d   :  { %104 = vsyncpa [#allocation5], 1 }

</bundles_post_ra>
